<compile_context>
chip_gen: v7x
topology: tpu7x:2x2x1
jax: 0.10.0
libtpu: 0.0.40
codegen_flags: <defaults>
</compile_context>

<pallas_src>
import jax
import jax.numpy as jnp
from jax.experimental import pallas as pl
from jax.experimental.pallas import tpu as pltpu


def _contrastive_kernel(inv_t_ref,            # (1,1) f32 in SMEM
                        a_q_ref, c_q_ref,     # [TB, F] query-row tiles
                        a_k_ref, c_k_ref,     # [TB, F] key-row tiles
                        out_ref,              # [TB, 2] per-row losses
                        denom_a, denom_c,     # [TB, 1] f32 running denominators
                        aq_cache, cq_cache,   # [TB, F] bf16 normalized query tiles
                        pos_cache):           # [TB, 1] f32 positive dot-products
    qi = pl.program_id(0)
    ki = pl.program_id(1)

    inv_t = inv_t_ref[0, 0]
    eps2 = jnp.float32(1e-24)  # (F.normalize eps)**2

    def normalize(x):
        # x / max(||x||_2, eps) == x * rsqrt(max(sum(x^2), eps^2))
        x = x.astype(jnp.float32)
        ssq = jnp.sum(x * x, axis=1, keepdims=True)           # [TB, 1]
        return x * jax.lax.rsqrt(jnp.maximum(ssq, eps2))        # EUP rsqrt per row

    @pl.when(ki == 0)
    def _():
        # Query-block work is done once per row block and cached for all ki.
        a_q = normalize(a_q_ref[...])
        c_q = normalize(c_q_ref[...])
        aq_cache[...] = a_q.astype(jnp.bfloat16)
        cq_cache[...] = c_q.astype(jnp.bfloat16)
        # positive pair for rows i and B+i is the same value: a_n[i] . c_n[i]
        pos_cache[...] = jnp.sum(a_q * c_q, axis=1, keepdims=True)
        denom_a[...] = jnp.zeros_like(denom_a)
        denom_c[...] = jnp.zeros_like(denom_c)

    a_qb = aq_cache[...]
    c_qb = cq_cache[...]
    a_kb = normalize(a_k_ref[...]).astype(jnp.bfloat16)
    c_kb = normalize(c_k_ref[...]).astype(jnp.bfloat16)

    def sim(x, y):
        # rows of x vs rows of y (unit vectors -> cosine similarity).
        return jax.lax.dot_general(
            x, y, dimension_numbers=(((1,), (1,)), ((), ())),
            preferred_element_type=jnp.float32)

    tb = a_qb.shape[0]
    row = jax.lax.broadcasted_iota(jnp.int32, (tb, tb), 0)
    col = jax.lax.broadcasted_iota(jnp.int32, (tb, tb), 1)
    # global i == j only when the query block equals the key block AND the
    # local indices match; ac/ca blocks never hit the excluded diagonal.
    offdiag = jnp.logical_or(row != col, qi != ki)

    exp_aa = jnp.where(offdiag, jnp.exp(sim(a_qb, a_kb) * inv_t), 0.0)
    exp_cc = jnp.where(offdiag, jnp.exp(sim(c_qb, c_kb) * inv_t), 0.0)
    exp_ac = jnp.exp(sim(a_qb, c_kb) * inv_t)
    exp_ca = jnp.exp(sim(c_qb, a_kb) * inv_t)

    denom_a[...] += (jnp.sum(exp_aa, axis=1, keepdims=True)
                     + jnp.sum(exp_ac, axis=1, keepdims=True))
    denom_c[...] += (jnp.sum(exp_ca, axis=1, keepdims=True)
                     + jnp.sum(exp_cc, axis=1, keepdims=True))

    @pl.when(ki == pl.num_programs(1) - 1)
    def _():
        scaled = pos_cache[...] * inv_t
        loss_a = jnp.log(denom_a[...]) - scaled                 # anchor-half rows
        loss_c = jnp.log(denom_c[...]) - scaled                 # contrast-half rows
        out_ref[...] = jnp.concatenate([loss_a, loss_c], axis=1)


def contrastive_loss_unsupervised(anchor, contrast, temperature=0.07):
    """anchor: [B, F]; contrast: [B, n_token, D] with n_token*D == F."""
    b = anchor.shape[0]
    a2 = anchor.reshape(b, -1).astype(jnp.float32)     # flatten(1)
    c2 = contrast.reshape(b, -1).astype(jnp.float32)   # flatten(1)
    assert a2.shape == c2.shape, (
        "anchor and (flattened) contrast features must have equal feature dim")
    f = a2.shape[1]

    # Row-block size along the batch. For aligned batches use 128-row tiles so
    # the query axis can be split across TensorCores; otherwise fall back to a
    # single full block (still legal since block == full array dim).
    tb = 128 if (b % 128 == 0) else b
    grid = (b // tb, b // tb)

    inv_t = jnp.full((1, 1), 1.0 / temperature, dtype=jnp.float32)

    # VMEM budget: 4 double-buffered [tb, f] f32 feature tiles, the bf16 query
    # caches, and a handful of [tb, tb] f32 similarity intermediates + slack.
    feat_bytes = 4 * 2 * tb * f * 4          # input tiles, double-buffered
    cache_bytes = 2 * tb * f * 2 + 3 * tb * 4
    sim_bytes = 12 * tb * tb * 4
    vmem_limit = int(min(64 * 1024 * 1024,
                         max(16 * 1024 * 1024,
                             feat_bytes + cache_bytes + sim_bytes + (4 << 20))))

    per_row = pl.pallas_call(
        _contrastive_kernel,
        out_shape=jax.ShapeDtypeStruct((b, 2), jnp.float32),
        grid_spec=pltpu.PrefetchScalarGridSpec(
            num_scalar_prefetch=0,
            grid=grid,
            in_specs=[
                pl.BlockSpec(memory_space=pltpu.MemorySpace.SMEM),  # 1/T scalar
                pl.BlockSpec((tb, f), lambda q, k: (q, 0)),         # anchor   (query rows)
                pl.BlockSpec((tb, f), lambda q, k: (q, 0)),         # contrast (query rows)
                pl.BlockSpec((tb, f), lambda q, k: (k, 0)),         # anchor   (key rows)
                pl.BlockSpec((tb, f), lambda q, k: (k, 0)),         # contrast (key rows)
            ],
            out_specs=pl.BlockSpec((tb, 2), lambda q, k: (q, 0)),
            scratch_shapes=[
                pltpu.VMEM((tb, 1), jnp.float32),    # running denom (anchor rows)
                pltpu.VMEM((tb, 1), jnp.float32),    # running denom (contrast rows)
                pltpu.VMEM((tb, f), jnp.bfloat16),   # cached normalized anchor queries
                pltpu.VMEM((tb, f), jnp.bfloat16),   # cached normalized contrast queries
                pltpu.VMEM((tb, 1), jnp.float32),    # cached positive dot-products
            ]),
        compiler_params=pltpu.CompilerParams(
            dimension_semantics=("parallel", "arbitrary"),
            vmem_limit_bytes=vmem_limit),
    )(inv_t, a2, c2, a2, c2)

    # Final scalar reduction (2B values) is trivial; do it in plain JAX.
    return jnp.sum(per_row) / jnp.float32(2 * b)


def _reference_loss(anchor, contrast, temperature=0.07):
    """Pure-JAX (f32) reference mirroring the PyTorch module."""
    b = anchor.shape[0]
    a = anchor.reshape(b, -1)
    c = contrast.reshape(b, -1)
    a = a / jnp.maximum(jnp.linalg.norm(a, axis=1, keepdims=True), 1e-12)
    c = c / jnp.maximum(jnp.linalg.norm(c, axis=1, keepdims=True), 1e-12)
    feat = jnp.concatenate([a, c], axis=0)
    sim = feat @ feat.T
    n2 = 2 * b
    mask = (~jnp.eye(n2, dtype=bool)).astype(jnp.float32)
    sim_ij = jnp.diagonal(sim, offset=b)
    sim_ji = jnp.diagonal(sim, offset=-b)
    positives = jnp.concatenate([sim_ij, sim_ji], axis=0)
    numerator = jnp.exp(positives / temperature)
    denominator = jnp.sum(mask * jnp.exp(sim / temperature), axis=1)
    all_losses = -jnp.log(numerator / denominator)
    return jnp.sum(all_losses) / (2 * b)


if __name__ == "__main__":
    key = jax.random.PRNGKey(0)
    k1, k2 = jax.random.split(key)

    B, N_TOKEN, D = 4, 8, 16          # feature dim F = n_token * D = 128
    F = N_TOKEN * D

    anchor = jax.random.normal(k1, (B, F), dtype=jnp.float32)
    contrast = jax.random.normal(k2, (B, N_TOKEN, D), dtype=jnp.float32)

    loss = contrastive_loss_unsupervised(anchor, contrast, temperature=0.07)
    loss = jax.block_until_ready(loss)

    ref = _reference_loss(anchor, contrast, temperature=0.07)
    # Similarity matmuls use bf16 MXU operands (f32 accumulation), so allow a
    # slightly looser tolerance than a pure-f32 comparison.
    assert jnp.allclose(loss, ref, rtol=1e-2, atol=1e-2), (loss, ref)

    # TODO(synk): supervised_contrastive_loss branch (data-dependent Python
    # loops over label pairs) is not implemented as a Pallas kernel.
    print("KERNEL_OK")
</pallas_src>

<mosaic_0001>
module attributes {stable_mosaic.version = 11 : i64} {
  func.func @_contrastive_kernel(%arg0: i32, %arg1: i32, %arg2: memref<1x1xf32, #tpu.memory_space<smem>>, %arg3: memref<4x128xf32, #tpu.memory_space<vmem>>, %arg4: memref<4x128xf32, #tpu.memory_space<vmem>>, %arg5: memref<4x128xf32, #tpu.memory_space<vmem>>, %arg6: memref<4x128xf32, #tpu.memory_space<vmem>>, %arg7: memref<4x2xf32, #tpu.memory_space<vmem>>, %arg8: memref<4x1xf32, #tpu.memory_space<vmem>>, %arg9: memref<4x1xf32, #tpu.memory_space<vmem>>, %arg10: memref<4x128xbf16, #tpu.memory_space<vmem>>, %arg11: memref<4x128xbf16, #tpu.memory_space<vmem>>, %arg12: memref<4x1xf32, #tpu.memory_space<vmem>>) attributes {dimension_semantics = [#tpu.dimension_semantics<parallel>, #tpu.dimension_semantics<arbitrary>], iteration_bounds = array<i64: 1, 1>, scalar_prefetch = 0 : i64, scratch_operands = 5 : i64, tpu.core_type = #tpu.core_type<tc>, window_params = [{transform_indices = @transform_0, window_bounds = array<i64: 1, 1>}, {transform_indices = @transform_1, window_bounds = array<i64: 4, 128>}, {transform_indices = @transform_2, window_bounds = array<i64: 4, 128>}, {transform_indices = @transform_3, window_bounds = array<i64: 4, 128>}, {transform_indices = @transform_4, window_bounds = array<i64: 4, 128>}, {transform_indices = @transform_5, window_bounds = array<i64: 4, 2>}]} {
    %c0 = arith.constant 0 : index
    %c0_0 = arith.constant 0 : index
    %0 = memref.load %arg2[%c0, %c0_0] : memref<1x1xf32, #tpu.memory_space<smem>>
    %c0_i32 = arith.constant 0 : i32
    %1 = arith.cmpi eq, %arg1, %c0_i32 : i32
    %2 = arith.extui %1 : i1 to i32
    %cst = arith.constant 1.000000e-24 : f32
    %c0_i32_1 = arith.constant 0 : i32
    %3 = arith.cmpi ne, %2, %c0_i32_1 : i32
    scf.if %3 {
      %c0_34 = arith.constant 0 : index
      %c0_35 = arith.constant 0 : index
      %71 = vector.load %arg3[%c0_34, %c0_35] : memref<4x128xf32, #tpu.memory_space<vmem>>, vector<4x128xf32>
      %72 = arith.mulf %71, %71 : vector<4x128xf32>
      %cst_36 = arith.constant dense<0.000000e+00> : vector<4xf32>
      %73 = vector.multi_reduction <add>, %72, %cst_36 [1] : vector<4x128xf32> to vector<4xf32>
      %74 = vector.shape_cast %73 : vector<4xf32> to vector<4x1xf32>
      %75 = vector.broadcast %cst : f32 to vector<4x1xf32>
      %76 = arith.maximumf %74, %75 : vector<4x1xf32>
      %77 = math.rsqrt %76 : vector<4x1xf32>
      %78 = vector.broadcast %77 : vector<4x1xf32> to vector<4x128xf32>
      %79 = arith.mulf %71, %78 : vector<4x128xf32>
      %c0_37 = arith.constant 0 : index
      %c0_38 = arith.constant 0 : index
      %80 = vector.load %arg4[%c0_37, %c0_38] : memref<4x128xf32, #tpu.memory_space<vmem>>, vector<4x128xf32>
      %81 = arith.mulf %80, %80 : vector<4x128xf32>
      %cst_39 = arith.constant dense<0.000000e+00> : vector<4xf32>
      %82 = vector.multi_reduction <add>, %81, %cst_39 [1] : vector<4x128xf32> to vector<4xf32>
      %83 = vector.shape_cast %82 : vector<4xf32> to vector<4x1xf32>
      %84 = vector.broadcast %cst : f32 to vector<4x1xf32>
      %85 = arith.maximumf %83, %84 : vector<4x1xf32>
      %86 = math.rsqrt %85 : vector<4x1xf32>
      %87 = vector.broadcast %86 : vector<4x1xf32> to vector<4x128xf32>
      %88 = arith.mulf %80, %87 : vector<4x128xf32>
      %89 = arith.truncf %79 : vector<4x128xf32> to vector<4x128xbf16>
      %c0_40 = arith.constant 0 : index
      %c0_41 = arith.constant 0 : index
      %90 = vector.load %arg10[%c0_40, %c0_41] : memref<4x128xbf16, #tpu.memory_space<vmem>>, vector<4x128xbf16>
      tpu.vector_store %arg10[%c0_40, %c0_41], %89 {strides = array<i32>} : memref<4x128xbf16, #tpu.memory_space<vmem>>, vector<4x128xbf16>,
      %91 = arith.truncf %88 : vector<4x128xf32> to vector<4x128xbf16>
      %c0_42 = arith.constant 0 : index
      %c0_43 = arith.constant 0 : index
      %92 = vector.load %arg11[%c0_42, %c0_43] : memref<4x128xbf16, #tpu.memory_space<vmem>>, vector<4x128xbf16>
      tpu.vector_store %arg11[%c0_42, %c0_43], %91 {strides = array<i32>} : memref<4x128xbf16, #tpu.memory_space<vmem>>, vector<4x128xbf16>,
      %93 = arith.mulf %79, %88 : vector<4x128xf32>
      %cst_44 = arith.constant dense<0.000000e+00> : vector<4xf32>
      %94 = vector.multi_reduction <add>, %93, %cst_44 [1] : vector<4x128xf32> to vector<4xf32>
      %95 = vector.shape_cast %94 : vector<4xf32> to vector<4x1xf32>
      %c0_45 = arith.constant 0 : index
      %c0_46 = arith.constant 0 : index
      %96 = vector.load %arg12[%c0_45, %c0_46] : memref<4x1xf32, #tpu.memory_space<vmem>>, vector<4x1xf32>
      tpu.vector_store %arg12[%c0_45, %c0_46], %95 {strides = array<i32>} : memref<4x1xf32, #tpu.memory_space<vmem>>, vector<4x1xf32>,
      %cst_47 = arith.constant 0.000000e+00 : f32
      %97 = vector.broadcast %cst_47 : f32 to vector<4x1xf32>
      %c0_48 = arith.constant 0 : index
      %c0_49 = arith.constant 0 : index
      %98 = vector.load %arg8[%c0_48, %c0_49] : memref<4x1xf32, #tpu.memory_space<vmem>>, vector<4x1xf32>
      tpu.vector_store %arg8[%c0_48, %c0_49], %97 {strides = array<i32>} : memref<4x1xf32, #tpu.memory_space<vmem>>, vector<4x1xf32>,
      %cst_50 = arith.constant 0.000000e+00 : f32
      %99 = vector.broadcast %cst_50 : f32 to vector<4x1xf32>
      %c0_51 = arith.constant 0 : index
      %c0_52 = arith.constant 0 : index
      %100 = vector.load %arg9[%c0_51, %c0_52] : memref<4x1xf32, #tpu.memory_space<vmem>>, vector<4x1xf32>
      tpu.vector_store %arg9[%c0_51, %c0_52], %99 {strides = array<i32>} : memref<4x1xf32, #tpu.memory_space<vmem>>, vector<4x1xf32>,
    } else {
    }
    %c0_2 = arith.constant 0 : index
    %c0_3 = arith.constant 0 : index
    %4 = vector.load %arg10[%c0_2, %c0_3] : memref<4x128xbf16, #tpu.memory_space<vmem>>, vector<4x128xbf16>
    %c0_4 = arith.constant 0 : index
    %c0_5 = arith.constant 0 : index
    %5 = vector.load %arg11[%c0_4, %c0_5] : memref<4x128xbf16, #tpu.memory_space<vmem>>, vector<4x128xbf16>
    %c0_6 = arith.constant 0 : index
    %c0_7 = arith.constant 0 : index
    %6 = vector.load %arg5[%c0_6, %c0_7] : memref<4x128xf32, #tpu.memory_space<vmem>>, vector<4x128xf32>
    %7 = arith.mulf %6, %6 : vector<4x128xf32>
    %cst_8 = arith.constant dense<0.000000e+00> : vector<4xf32>
    %8 = vector.multi_reduction <add>, %7, %cst_8 [1] : vector<4x128xf32> to vector<4xf32>
    %9 = vector.shape_cast %8 : vector<4xf32> to vector<4x1xf32>
    %cst_9 = arith.constant 1.000000e-24 : f32
    %10 = vector.broadcast %cst_9 : f32 to vector<4x1xf32>
    %11 = arith.maximumf %9, %10 : vector<4x1xf32>
    %12 = math.rsqrt %11 : vector<4x1xf32>
    %13 = vector.broadcast %12 : vector<4x1xf32> to vector<4x128xf32>
    %14 = arith.mulf %6, %13 : vector<4x128xf32>
    %15 = arith.truncf %14 : vector<4x128xf32> to vector<4x128xbf16>
    %c0_10 = arith.constant 0 : index
    %c0_11 = arith.constant 0 : index
    %16 = vector.load %arg6[%c0_10, %c0_11] : memref<4x128xf32, #tpu.memory_space<vmem>>, vector<4x128xf32>
    %17 = arith.mulf %16, %16 : vector<4x128xf32>
    %cst_12 = arith.constant dense<0.000000e+00> : vector<4xf32>
    %18 = vector.multi_reduction <add>, %17, %cst_12 [1] : vector<4x128xf32> to vector<4xf32>
    %19 = vector.shape_cast %18 : vector<4xf32> to vector<4x1xf32>
    %cst_13 = arith.constant 1.000000e-24 : f32
    %20 = vector.broadcast %cst_13 : f32 to vector<4x1xf32>
    %21 = arith.maximumf %19, %20 : vector<4x1xf32>
    %22 = math.rsqrt %21 : vector<4x1xf32>
    %23 = vector.broadcast %22 : vector<4x1xf32> to vector<4x128xf32>
    %24 = arith.mulf %16, %23 : vector<4x128xf32>
    %25 = arith.truncf %24 : vector<4x128xf32> to vector<4x128xbf16>
    %26 = tpu.iota {dimensions = array<i32: 0>} : vector<4x4xi32>
    %27 = tpu.iota {dimensions = array<i32: 1>} : vector<4x4xi32>
    %28 = arith.cmpi ne, %26, %27 : vector<4x4xi32>
    %29 = arith.cmpi ne, %arg0, %arg1 : i32
    %30 = vector.broadcast %29 : i1 to vector<4x4xi1>
    %31 = arith.ori %28, %30 : vector<4x4xi1>
    %cst_14 = arith.constant dense<0.000000e+00> : vector<4x4xf32>
    %32 = tpu.matmul %4, %15, %cst_14 {dimension_numbers = #tpu.dot_dimension_numbers<[1], [1], [0], [0], [0, 0, 1, 0], [], []>} : vector<4x128xbf16>, vector<4x128xbf16>, vector<4x4xf32> -> vector<4x4xf32>
    %33 = vector.broadcast %0 : f32 to vector<4x4xf32>
    %34 = arith.mulf %32, %33 : vector<4x4xf32>
    %35 = math.exp %34 : vector<4x4xf32>
    %cst_15 = arith.constant 0.000000e+00 : f32
    %36 = vector.broadcast %cst_15 : f32 to vector<4x4xf32>
    %37 = arith.select %31, %35, %36 : vector<4x4xi1>, vector<4x4xf32>
    %cst_16 = arith.constant dense<0.000000e+00> : vector<4x4xf32>
    %38 = tpu.matmul %5, %25, %cst_16 {dimension_numbers = #tpu.dot_dimension_numbers<[1], [1], [0], [0], [0, 0, 1, 0], [], []>} : vector<4x128xbf16>, vector<4x128xbf16>, vector<4x4xf32> -> vector<4x4xf32>
    %39 = vector.broadcast %0 : f32 to vector<4x4xf32>
    %40 = arith.mulf %38, %39 : vector<4x4xf32>
    %41 = math.exp %40 : vector<4x4xf32>
    %cst_17 = arith.constant 0.000000e+00 : f32
    %42 = vector.broadcast %cst_17 : f32 to vector<4x4xf32>
    %43 = arith.select %31, %41, %42 : vector<4x4xi1>, vector<4x4xf32>
    %cst_18 = arith.constant dense<0.000000e+00> : vector<4x4xf32>
    %44 = tpu.matmul %4, %25, %cst_18 {dimension_numbers = #tpu.dot_dimension_numbers<[1], [1], [0], [0], [0, 0, 1, 0], [], []>} : vector<4x128xbf16>, vector<4x128xbf16>, vector<4x4xf32> -> vector<4x4xf32>
    %45 = vector.broadcast %0 : f32 to vector<4x4xf32>
    %46 = arith.mulf %44, %45 : vector<4x4xf32>
    %47 = math.exp %46 : vector<4x4xf32>
    %cst_19 = arith.constant dense<0.000000e+00> : vector<4x4xf32>
    %48 = tpu.matmul %5, %15, %cst_19 {dimension_numbers = #tpu.dot_dimension_numbers<[1], [1], [0], [0], [0, 0, 1, 0], [], []>} : vector<4x128xbf16>, vector<4x128xbf16>, vector<4x4xf32> -> vector<4x4xf32>
    %49 = vector.broadcast %0 : f32 to vector<4x4xf32>
    %50 = arith.mulf %48, %49 : vector<4x4xf32>
    %51 = math.exp %50 : vector<4x4xf32>
    %c0_20 = arith.constant 0 : index
    %c0_21 = arith.constant 0 : index
    %52 = vector.load %arg8[%c0_20, %c0_21] : memref<4x1xf32, #tpu.memory_space<vmem>>, vector<4x1xf32>
    %cst_22 = arith.constant dense<0.000000e+00> : vector<4xf32>
    %53 = vector.multi_reduction <add>, %37, %cst_22 [1] : vector<4x4xf32> to vector<4xf32>
    %54 = vector.shape_cast %53 : vector<4xf32> to vector<4x1xf32>
    %cst_23 = arith.constant dense<0.000000e+00> : vector<4xf32>
    %55 = vector.multi_reduction <add>, %47, %cst_23 [1] : vector<4x4xf32> to vector<4xf32>
    %56 = vector.shape_cast %55 : vector<4xf32> to vector<4x1xf32>
    %57 = arith.addf %54, %56 : vector<4x1xf32>
    %58 = arith.addf %52, %57 : vector<4x1xf32>
    %c0_24 = arith.constant 0 : index
    %c0_25 = arith.constant 0 : index
    %59 = vector.load %arg8[%c0_24, %c0_25] : memref<4x1xf32, #tpu.memory_space<vmem>>, vector<4x1xf32>
    tpu.vector_store %arg8[%c0_24, %c0_25], %58 {strides = array<i32>} : memref<4x1xf32, #tpu.memory_space<vmem>>, vector<4x1xf32>,
    %c0_26 = arith.constant 0 : index
    %c0_27 = arith.constant 0 : index
    %60 = vector.load %arg9[%c0_26, %c0_27] : memref<4x1xf32, #tpu.memory_space<vmem>>, vector<4x1xf32>
    %cst_28 = arith.constant dense<0.000000e+00> : vector<4xf32>
    %61 = vector.multi_reduction <add>, %51, %cst_28 [1] : vector<4x4xf32> to vector<4xf32>
    %62 = vector.shape_cast %61 : vector<4xf32> to vector<4x1xf32>
    %cst_29 = arith.constant dense<0.000000e+00> : vector<4xf32>
    %63 = vector.multi_reduction <add>, %43, %cst_29 [1] : vector<4x4xf32> to vector<4xf32>
    %64 = vector.shape_cast %63 : vector<4xf32> to vector<4x1xf32>
    %65 = arith.addf %62, %64 : vector<4x1xf32>
    %66 = arith.addf %60, %65 : vector<4x1xf32>
    %c0_30 = arith.constant 0 : index
    %c0_31 = arith.constant 0 : index
    %67 = vector.load %arg9[%c0_30, %c0_31] : memref<4x1xf32, #tpu.memory_space<vmem>>, vector<4x1xf32>
    tpu.vector_store %arg9[%c0_30, %c0_31], %66 {strides = array<i32>} : memref<4x1xf32, #tpu.memory_space<vmem>>, vector<4x1xf32>,
    %c0_i32_32 = arith.constant 0 : i32
    %68 = arith.cmpi eq, %arg1, %c0_i32_32 : i32
    %69 = arith.extui %68 : i1 to i32
    %c0_i32_33 = arith.constant 0 : i32
    %70 = arith.cmpi ne, %69, %c0_i32_33 : i32
    scf.if %70 {
      %c0_34 = arith.constant 0 : index
      %c0_35 = arith.constant 0 : index
      %71 = vector.load %arg12[%c0_34, %c0_35] : memref<4x1xf32, #tpu.memory_space<vmem>>, vector<4x1xf32>
      %72 = vector.broadcast %0 : f32 to vector<4x1xf32>
      %73 = arith.mulf %71, %72 : vector<4x1xf32>
      %c0_36 = arith.constant 0 : index
      %c0_37 = arith.constant 0 : index
      %74 = vector.load %arg8[%c0_36, %c0_37] : memref<4x1xf32, #tpu.memory_space<vmem>>, vector<4x1xf32>
      %75 = math.log %74 : vector<4x1xf32>
      %76 = arith.subf %75, %73 : vector<4x1xf32>
      %c0_38 = arith.constant 0 : index
      %c0_39 = arith.constant 0 : index
      %77 = vector.load %arg9[%c0_38, %c0_39] : memref<4x1xf32, #tpu.memory_space<vmem>>, vector<4x1xf32>
      %78 = math.log %77 : vector<4x1xf32>
      %79 = arith.subf %78, %73 : vector<4x1xf32>
      %80 = tpu.concatenate %76, %79 in 1 : vector<4x1xf32>, vector<4x1xf32> -> vector<4x2xf32>
      %c0_40 = arith.constant 0 : index
      %c0_41 = arith.constant 0 : index
      %81 = vector.load %arg7[%c0_40, %c0_41] : memref<4x2xf32, #tpu.memory_space<vmem>>, vector<4x2xf32>
      tpu.vector_store %arg7[%c0_40, %c0_41], %80 {strides = array<i32>} : memref<4x2xf32, #tpu.memory_space<vmem>>, vector<4x2xf32>,
    } else {
    }
    return
  }
  func.func @transform_0(%arg0: i32, %arg1: i32) -> (i32, i32) {
    %c0_i32 = arith.constant 0 : i32
    %c0_i32_0 = arith.constant 0 : i32
    %c0_i32_1 = arith.constant 0 : i32
    return %c0_i32, %c0_i32_0 : i32, i32
  }
  func.func @transform_1(%arg0: i32, %arg1: i32) -> (i32, i32) {
    %c0_i32 = arith.constant 0 : i32
    %c0_i32_0 = arith.constant 0 : i32
    return %arg0, %c0_i32 : i32, i32
  }
  func.func @transform_2(%arg0: i32, %arg1: i32) -> (i32, i32) {
    %c0_i32 = arith.constant 0 : i32
    %c0_i32_0 = arith.constant 0 : i32
    return %arg0, %c0_i32 : i32, i32
  }
  func.func @transform_3(%arg0: i32, %arg1: i32) -> (i32, i32) {
    %c0_i32 = arith.constant 0 : i32
    %c0_i32_0 = arith.constant 0 : i32
    return %arg1, %c0_i32 : i32, i32
  }
  func.func @transform_4(%arg0: i32, %arg1: i32) -> (i32, i32) {
    %c0_i32 = arith.constant 0 : i32
    %c0_i32_0 = arith.constant 0 : i32
    return %arg1, %c0_i32 : i32, i32
  }
  func.func @transform_5(%arg0: i32, %arg1: i32) -> (i32, i32) {
    %c0_i32 = arith.constant 0 : i32
    %c0_i32_0 = arith.constant 0 : i32
    return %arg0, %c0_i32 : i32, i32
  }
}

</mosaic_0001>

<bundles_post_ra>
// kernel: tpu_custom_call.1
= control target key start
LH: loop header
LB: loop body
LE: loop exit
PB: predicated region body
PF: predicated region fallthrough
CT: control target
= control target key end

     0   :  { %11 = vsyncpa [#allocation9], 0  ;;  %s402_s18 = smov [#allocation8]   ;;  %s498_s0 = inlined_call_operand.<no memory space> [shape: f32[1,1], index: 0, kind: input, shape index: {}]   ;;  %s499_s1 = inlined_call_operand.hbm [shape: f32[4,128], index: 1, kind: input, shape index: {}]   ;;  %s500_s2 = inlined_call_operand.vmem [shape: f32[4,128], index: 2, kind: input, shape index: {}]   ;;  %s501_s3 = inlined_call_operand.vmem [shape: f32[4,128], index: 3, kind: input, shape index: {}]   ;;  %s502_s4 = inlined_call_operand.vmem [shape: f32[4,128], index: 4, kind: input, shape index: {}]   ;;  %s503_s5 = inlined_call_operand.vmem [shape: f32[4,2], index: 5, kind: output, shape index: {}]  }
   0x1   :  { %s20_s19 = sshll.u32 %s402_s18, 4  ;;  %s378_s22 = scalar_lea.hbm %s499_s1, 64  ;;  %s21_s19 = int_to_ptr.vmem [resolvable:$true] %s20_s19 }
   0x2   :  { %p379_p0 = scmp.ne.s32.totalorder %s499_s1, %s378_s22  ;;  %p382_p1 = scmp.lt.u32.totalorder %s378_s22, %s499_s1 }
   0x4   :  { %p384_p2 = pnand %p382_p1, %p379_p0 }
   0x6   :  { %387 = shalt.err (!%p384_p2)
}
   0x7   :  { %s388_s27 = scalar_lea.vmem %s21_s19, 64  ;;  %p393_p4 = scmp.lt.s32.totalorder %s21_s19, %s21_s19 }
   0x8   :  { %p389_p3 = scmp.ne.s32.totalorder %s21_s19, %s388_s27  ;;  %p394_p5 = scmp.lt.s32.totalorder %s388_s27, %s388_s27 }
   0xa   :  { %p395_p6 = por %p394_p5, %p393_p4 }
   0xc   :  { %p396_p7 = pnand %p395_p6, %p389_p3 }
   0xe   :  { %399 = shalt.err (!%p396_p7)
}
   0xf   :  { %23 = dma.hbm_to_vmem [thread:$0]  %s499_s1, 64, %s21_s19, [#allocation9]  }
  0x10   :  { %400 = dma.done.wait [#allocation9], 64  }
  0x11   :  { %401 = vsyncadd [#allocation9], 4294967232  ;;  %vm41_vm0 = vcmask 1043456   ;;  %v70_v0 = vld [vmem:[%s501_s3] sm:$0xf]  ;;  %v403_v12 = vmov 0.0   ;;  %v476_v36 = vstv %s498_s0  ;;  %v89_v49 = vlaneseq }
  0x12   :  { %v48_v1 = vld [vmem:[%s500_s2] sm:$0xf]  ;;  %v71_v3 = vmul.f32 %v70_v0, %v70_v0  ;;  %v39_v6 = vld [vmem:[#allocation8] sm:$0xf]  ;;  %330 = vmatprep.subr.bf16.mxu0 %v403_v12  ;;  %336 = vmatprep.subr.bf16.mxu1 %v403_v12  ;;  %vm404_vm1 = vmmov 0   ;;  %vm275_vm3 = vcmask 27648  }
  0x13   :  { %v80_v2 = vld [vmem:[%s502_s4] sm:$0xf]  ;;  %v49_v4 = vmul.f32 %v48_v1, %v48_v1  ;;  %v40_v7 = vmul.f32 %v39_v6, %v39_v6  ;;  %338 = vmatprep.mubr.msk.bf16.mxu1 %vm404_vm1, %v403_v12  ;;  %332 = vmatprep.mubr.msk.bf16.mxu0 %vm404_vm1, %v403_v12  ;;  %v90_v53 = vshrl.u32 %v89_v49, 7  ;;  %v92_v54 = vand.u32 127, %v89_v49  ;;  %s405_s0 = smov 1  }
  0x14   :  { %v81_v5 = vmul.f32 %v80_v2, %v80_v2  ;;  %v73_v8 = vsel %vm41_vm0, %v71_v3, 0.0  ;;  %vm64_vm4 = vcmask 3072   ;;  %vm313_vm5 = vcmask 7168  }
  0x15   :  { %v50_v9 = vsel %vm41_vm0, %v49_v4, 0.0  ;;  %74 = vadd.xlane.f32.xlu1 %v73_v8  ;;  %v42_v11 = vsel %vm41_vm0, %v40_v7, 0.0  ;;  %vm93_vm2 = vcmp.ne.s32.totalorder %v90_v53, %v92_v54  ;;  %67 = vst.msk [vmem:[#allocation3] sm:$0xf] %vm64_vm4, %v403_v12  ;;  %66 = vst.msk [vmem:[#allocation2] sm:$0xf] %vm64_vm4, %v403_v12 }
  0x16   :  { %51 = vadd.xlane.f32.xlu0 %v50_v9  ;;  %v82_v10 = vsel %vm41_vm0, %v81_v5, 0.0  ;;  %vm315_vm6 = vcmask 11264  }
  0x19   :  { %43 = vadd.xlane.f32.xlu1 %v42_v11 }
  0x1a   :  { %83 = vadd.xlane.f32.xlu0 %v82_v10 }
  0xa2   :  { %v75_v13 = vpop.xlane.xlu1 %74 }
  0xa3   :  { %v52_v14 = vpop.xlane.xlu0 %51  ;;  %v76_v15 = vmax.f32 %v75_v13, 1e-24  ;;  %v286_v13 = vld [vmem:[#allocation3] sm:$0xf] }
  0xa4   :  { %v53_v16 = vmax.f32 %v52_v14, 1e-24 }
  0xa5   :  { %358 = vrsqrt.f32 %v76_v15 }
  0xa6   :  { %360 = vrsqrt.f32 %v53_v16  ;;  %v44_v18 = vpop.xlane.xlu1 %43 }
  0xa7   :  { %v84_v17 = vpop.xlane.xlu0 %83  ;;  %v45_v20 = vmax.f32 %v44_v18, 1e-24 }
  0xa8   :  { %v85_v19 = vmax.f32 %v84_v17, 1e-24 }
  0xaa   :  { %362 = vrsqrt.f32 %v85_v19 }
  0xab   :  { %364 = vrsqrt.f32 %v45_v20  ;;  %v274_v20 = vld [vmem:[#allocation2] sm:$0xf] }
  0xaf   :  { %v359_v21 = vpop.eup %358 }
  0xb0   :  { %v361_v22 = vpop.eup %360  ;;  %v78_v23 = vmul.f32 %v359_v21, %v70_v0 }
  0xb1   :  { %v55_v24 = vmul.f32 %v361_v22, %v48_v1 }
  0xb2   :  { %v79_v25 = vpack.c.bf16 %v78_v23, %v78_v23 }
  0xb3   :  { %v58_v27 = vpack.c.bf16 %v55_v24, %v55_v24 }
  0xb4   :  { %v363_v26 = vpop.eup %362  ;;  %331 = vmatpush3.bf16.xpose.msra.mxu0 %v79_v25 }
  0xb5   :  { %v365_v28 = vpop.eup %364  ;;  %v87_v29 = vmul.f32 %v363_v26, %v80_v2  ;;  %59 = vst [vmem:[#allocation5] sm:$0x3] %v58_v27  ;;  %342 = vmatprep.subr.bf16.mxu0 %v403_v12 }
  0xb6   :  { %v47_v30 = vmul.f32 %v365_v28, %v39_v6 }
  0xb7   :  { %v88_v31 = vpack.c.bf16 %v87_v29, %v87_v29 }
  0xb8   :  { %v56_v32 = vpack.c.bf16 %v47_v30, %v47_v30  ;;  %v60_v33 = vmul.f32 %v55_v24, %v47_v30 }
  0xb9   :  { %337 = vmatpush3.bf16.xpose.msra.mxu1 %v88_v31 }
  0xba   :  { %57 = vst [vmem:[#allocation4] sm:$0x3] %v56_v32  ;;  %348 = vmatprep.subr.bf16.mxu1 %v403_v12  ;;  %v61_v9 = vsel %vm41_vm0, %v60_v33, 0.0 }
  0xbc   :  { %v69_v34 = vld [vmem:[#allocation5] sm:$0x3] }
  0xc0   :  { %339 = vmatmul.mubr.bf16.vlgmr.msra.gmra.mrb[0].mxu1 %v69_v34 }
  0xc1   :  { %v68_v35 = vld [vmem:[#allocation4] sm:$0x3]  ;;  %349 = vmatpush3.bf16.xpose.msra.mxu1 %v79_v25  ;;  %350 = vmatprep.mubr.msk.bf16.mxu1 %vm404_vm1, %v403_v12 }
  0xc2   :  { %333 = vmatmul.mubr.bf16.vlgmr.msra.gmra.mrb[0].mxu0 %v68_v35 }
  0xc3   :  { %343 = vmatpush3.bf16.xpose.msra.mxu0 %v88_v31  ;;  %344 = vmatprep.mubr.msk.bf16.mxu0 %vm404_vm1, %v403_v12 }
  0xc8   :  { %351 = vmatmul.mubr.bf16.vlgmr.msra.gmra.mrb[4].mxu1 %v69_v34 }
  0xca   :  { %345 = vmatmul.mubr.bf16.vlgmr.msra.gmra.mrb[4].mxu0 %v68_v35 }
 0x193   :  { %v178_v37 = vpop.f32.mrb[0].mxu1 }
 0x194   :  { %v184_v38 = vmul.f32 %v178_v37, %v476_v36  ;;  %v340_v39 = vpop.f32.mrb[1].mxu1 }
 0x195   :  { %v181_v40 = vpop.f32.mrb[2].mxu1  ;;  %v133_v41 = vpop.f32.mrb[0].mxu0 }
 0x196   :  { %v185_v42 = vmul.f32 1.442695, %v184_v38  ;;  %v341_v43 = vpop.f32.mrb[3].mxu1  ;;  %v140_v44 = vmul.f32 %v476_v36, %v133_v41  ;;  %v334_v45 = vpop.f32.mrb[1].mxu0 }
 0x197   :  { %v136_v46 = vpop.f32.mrb[2].mxu0 }
 0x198   :  { %366 = vpow2.f32 %v185_v42  ;;  %v141_v47 = vmul.f32 1.442695, %v140_v44  ;;  %v335_v48 = vpop.f32.mrb[3].mxu0 }
 0x19a   :  { %368 = vpow2.f32 %v141_v47 }
 0x19b   :  { %v265_v50 = vpop.f32.mrb[4].mxu1 }
 0x19c   :  { %v271_v51 = vmul.f32 %v265_v50, %v476_v36  ;;  %v352_v52 = vpop.f32.mrb[5].mxu1 }
 0x19d   :  { %v268_v55 = vpop.f32.mrb[6].mxu1  ;;  %v222_v56 = vpop.f32.mrb[4].mxu0 }
 0x19e   :  { %v272_v57 = vmul.f32 1.442695, %v271_v51  ;;  %v353_v58 = vpop.f32.mrb[7].mxu1  ;;  %v228_v59 = vmul.f32 %v222_v56, %v476_v36  ;;  %v346_v60 = vpop.f32.mrb[5].mxu0 }
 0x19f   :  { %v225_v61 = vpop.f32.mrb[6].mxu0 }
 0x1a0   :  { %370 = vpow2.f32 %v272_v57  ;;  %v229_v62 = vmul.f32 1.442695, %v228_v59  ;;  %v347_v63 = vpop.f32.mrb[7].mxu0 }
 0x1a2   :  { %v367_v0 = vpop.eup %366  ;;  %372 = vpow2.f32 %v229_v62 }
 0x1a3   :  { %v187_v1 = vsel %vm93_vm2, %v367_v0, 0.0 }
 0x1a4   :  { %v369_v2 = vpop.eup %368  ;;  %v290_v3 = vsel %vm275_vm3, %v187_v1, 0.0 }
 0x1a5   :  { %291 = vadd.xlane.f32.xlu1 %v290_v3  ;;  %v143_v4 = vsel %vm93_vm2, %v369_v2, 0.0 }
 0x1a6   :  { %v276_v5 = vsel %vm275_vm3, %v143_v4, 0.0 }
 0x1a9   :  { %277 = vadd.xlane.f32.xlu1 %v276_v5 }
 0x1aa   :  { %v371_v6 = vpop.eup %370 }
 0x1ab   :  { %v287_v7 = vsel %vm275_vm3, %v371_v6, 0.0 }
 0x1ac   :  { %288 = vadd.xlane.f32.xlu0 %v287_v7  ;;  %v373_v8 = vpop.eup %372 }
 0x1ad   :  { %v279_v10 = vsel %vm275_vm3, %v373_v8, 0.0 }
 0x1b0   :  { %62 = vadd.xlane.f32.xlu0 %v61_v9 }
 0x1b4   :  { %280 = vadd.xlane.f32.xlu0 %v279_v10 }
 0x232   :  { %v292_v11 = vpop.xlane.xlu1 %291 }
 0x236   :  { %v278_v18 = vpop.xlane.xlu1 %277 }
 0x239   :  { %v289_v14 = vpop.xlane.xlu0 %288 }
 0x23a   :  { %v293_v15 = vadd.f32 %v292_v11, %v289_v14 }
 0x23c   :  { %v294_v16 = vadd.f32 %v293_v15, %v286_v13 }
 0x23d   :  { %v63_v17 = vpop.xlane.xlu0 %62 }
 0x23e   :  { %295 = vst.msk [vmem:[#allocation3] sm:$0xf] %vm64_vm4, %v294_v16  ;;  %65 = vst.msk [vmem:[#allocation6] sm:$0xf] %vm64_vm4, %v63_v17 }
 0x241   :  { %v281_v19 = vpop.xlane.xlu0 %280 }
 0x242   :  { %v282_v21 = vadd.f32 %v281_v19, %v278_v18 }
 0x244   :  { %v283_v22 = vadd.f32 %v282_v21, %v274_v20 }
 0x245   :  { %v305_v23 = vld [vmem:[#allocation3] sm:$0xf]  ;;  %v299_v12 = vld [vmem:[#allocation6] sm:$0xf] }
 0x246   :  { %285 = vst.msk [vmem:[#allocation2] sm:$0xf] %vm64_vm4, %v283_v22  ;;  %374 = vlog2.f32 %v305_v23  ;;  %v300_v25 = vmul.f32 %v299_v12, %v476_v36 }
 0x24d   :  { %v301_v28 = vld [vmem:[#allocation2] sm:$0xf] }
 0x24e   :  { %376 = vlog2.f32 %v301_v28 }
 0x250   :  { %v375_v24 = vpop.eup %374 }
 0x251   :  { %v307_v26 = vmul.f32 0.6931472, %v375_v24 }
 0x253   :  { %v308_v27 = vsub.f32 %v307_v26, %v300_v25 }
 0x255   :  { %310 = vrot.lane.b32.xlu1 %v308_v27, %s405_s0 }
 0x258   :  { %v377_v29 = vpop.eup %376 }
 0x259   :  { %v303_v30 = vmul.f32 0.6931472, %v377_v29 }
 0x25b   :  { %v304_v31 = vsub.f32 %v303_v30, %v300_v25 }
 0x2c7   :  { %v311_v32 = vpop.permute.xlu1 %310 }
 0x2c8   :  { %v314_v33 = vsel %vm313_vm5, %v304_v31, %v311_v32 }
 0x2c9   :  { %316 = vst.msk [vmem:[%s503_s5] sm:$0xf] %vm315_vm6, %v314_v33 }
 0x2ca   :  { %321 = vsyncpa [#allocation9], 1 }

</bundles_post_ra>
